<compile_context>
chip_gen: v7x
topology: tpu7x:2x2x1
jax: 0.10.0
libtpu: 0.0.40
codegen_flags: <defaults>
</compile_context>

<pallas_src>
import jax
import jax.numpy as jnp
from jax import lax
from jax.experimental import pallas as pl
from jax.experimental.pallas import tpu as pltpu


def _erf(x):
    # Abramowitz & Stegun 7.1.26 rational approximation, |err| < 1.5e-7.
    # (Kept instead of lax.erf: guaranteed to lower in Mosaic; error is far
    # below the 1e-4 comparison tolerance, and on the collapsed path the GELU
    # is a tiny fraction of total work anyway.)
    a1, a2, a3, a4, a5 = (0.254829592, -0.284496736, 1.421413741,
                          -1.453152027, 1.061405429)
    p = 0.3275911
    sgn = jnp.where(x >= 0.0, 1.0, -1.0)
    ax = jnp.abs(x)
    t = 1.0 / (1.0 + p * ax)
    poly = ((((a5 * t + a4) * t + a3) * t + a2) * t + a1) * t
    return sgn * (1.0 - poly * jnp.exp(-ax * ax))


def _gelu(x):
    # exact (erf-based) GELU, matching torch.nn.GELU() default
    return 0.5 * x * (1.0 + _erf(x * 0.7071067811865476))


# ----------------------------------------------------------------------------
# Collapsed (default) kernel: out = broadcast((1/KD) * sum_L gelu(x @ Wv))
# ----------------------------------------------------------------------------
def _make_collapsed_kernel(TB, L, C, KD, VD):
    f32 = jnp.float32
    inv_kd = 1.0 / float(KD)

    def kernel(xl_ref, wv_ref, out_ref):
        # xl_ref: (TB, L, C)  wv_ref: (C, VD)  out_ref: (TB, KD, VD)
        # Flatten the batch block into the M dim of a single MXU matmul
        # (layout-preserving: L is a multiple of the 8-row sublane tile when
        # TB > 1, enforced by the wrapper's block picker).
        xl = xl_ref[...].reshape(TB * L, C)
        v = _gelu(jnp.dot(xl, wv_ref[...], preferred_element_type=f32))  # (TB*L, VD)
        # softmax over the broadcast KD axis is exactly 1/KD, so
        # attn @ V == (1/KD) * sum over L of V, identical for every k.
        pooled = jnp.sum(v.reshape(TB, L, VD), axis=1) * inv_kd          # (TB, VD)
        out_ref[...] = jnp.broadcast_to(
            pooled[:, None, :], (TB, KD, VD)).astype(out_ref.dtype)

    return kernel


# ----------------------------------------------------------------------------
# Literal kernel (flagged): all four matmuls + explicit softmax, per batch.
# ----------------------------------------------------------------------------
def _make_literal_kernel(L, C, G, KD, VD):
    f32 = jnp.float32
    inv_sqrt_kd = 1.0 / (float(KD) ** 0.5)

    def kernel(xl_ref, xg_ref, wk_ref, wv_ref, wq_ref, out_ref):
        xl = xl_ref[0]            # (L, C)
        xg = xg_ref[0]            # (1, G)
        K = jnp.tanh(jnp.dot(xl, wk_ref[...], preferred_element_type=f32))  # (L, KD)
        V = _gelu(jnp.dot(xl, wv_ref[...], preferred_element_type=f32))     # (L, VD)
        q = jnp.tanh(jnp.dot(xg, wq_ref[...], preferred_element_type=f32))  # (1, KD)

        # Q has KD identical rows; compute one score row and broadcast.
        s_row = lax.dot_general(q, K, (((1,), (1,)), ((), ())),
                                preferred_element_type=f32) * inv_sqrt_kd   # (1, L)
        scores = jnp.broadcast_to(s_row, (KD, L))                            # (KD, L)

        # softmax over dim=1 of the (B, KD, L) tensor -> axis 0 here
        m = jnp.max(scores, axis=0, keepdims=True)
        e = jnp.exp(scores - m)
        attn = e / jnp.sum(e, axis=0, keepdims=True)                         # (KD, L)

        out = jnp.dot(attn, V, preferred_element_type=f32)                   # (KD, VD)
        out_ref[...] = out[None].astype(out_ref.dtype)

    return kernel


def _pick_block_b(B, L):
    """Batch block size: block only when the (TB,L,C)->(TB*L,C) flatten is
    layout-preserving (L % 8 == 0), and keep >= 2 grid steps so the
    'parallel' axis can shard across v7x's two TensorCores."""
    if L % 8 == 0:
        for tb in (8, 4, 2):
            if B % tb == 0 and B // tb >= 2:
                return tb
    return 1


def global_attention_head(x_local, x_global, wv, wk, wq, *, key_dim,
                          block_b=None, literal=False):
    """Pallas forward of GlobalAttentionHead.

    x_local : (B, L, local_dim), x_global : (B, global_dim)
    wv : (local_dim, value_dim), wk : (local_dim, key_dim), wq : (global_dim, key_dim)
    returns (B, key_dim, value_dim)
    """
    B, L, C = x_local.shape
    G = x_global.shape[1]
    KD = key_dim
    VD = wv.shape[1]
    out_dtype = jnp.promote_types(x_local.dtype, wv.dtype)

    if literal:
        # Literal transcription of the module (kept for verification /
        # future-proofing if softmax axis is ever changed upstream).
        xg = x_global.reshape(B, 1, G)
        kernel = _make_literal_kernel(L, C, G, KD, VD)
        return pl.pallas_call(
            kernel,
            grid=(B,),
            out_shape=jax.ShapeDtypeStruct((B, KD, VD), out_dtype),
            in_specs=[
                pl.BlockSpec((1, L, C), lambda b: (b, 0, 0)),   # x_local
                pl.BlockSpec((1, 1, G), lambda b: (b, 0, 0)),   # x_global
                pl.BlockSpec((C, KD), lambda b: (0, 0)),        # Wk (VMEM-resident)
                pl.BlockSpec((C, VD), lambda b: (0, 0)),        # Wv (VMEM-resident)
                pl.BlockSpec((G, KD), lambda b: (0, 0)),        # Wq (VMEM-resident)
            ],
            out_specs=pl.BlockSpec((1, KD, VD), lambda b: (b, 0, 0)),
            compiler_params=pltpu.CompilerParams(
                dimension_semantics=("parallel",)),
        )(x_local, xg, wk, wv, wq)

    # ---------------- collapsed (default) path ----------------
    tb = block_b if block_b is not None else _pick_block_b(B, L)
    assert B % tb == 0, "block_b must divide the batch size"
    grid = (B // tb,)

    # Explicit VMEM budget: 2x double-buffered x_local block + resident Wv +
    # 2x output block + f32 temporaries, with margin; clamped to 32 MiB so it
    # is safe on every generation (v5e/v6e 128 MiB, v7x 64 MiB physical).
    xi = jnp.dtype(x_local.dtype).itemsize
    est = (2 * tb * L * C * xi
           + 2 * C * VD * jnp.dtype(wv.dtype).itemsize
           + 2 * tb * KD * VD * jnp.dtype(out_dtype).itemsize
           + tb * L * max(C, VD) * 4)
    vmem_limit = int(max(16 << 20, min(32 << 20, 2 * est + (2 << 20))))

    kernel = _make_collapsed_kernel(tb, L, C, KD, VD)
    return pl.pallas_call(
        kernel,
        grid=grid,
        out_shape=jax.ShapeDtypeStruct((B, KD, VD), out_dtype),
        in_specs=[
            pl.BlockSpec((tb, L, C), lambda b: (b, 0, 0)),  # x_local, native dtype
            pl.BlockSpec((C, VD), lambda b: (0, 0)),        # Wv, VMEM-resident
        ],
        out_specs=pl.BlockSpec((tb, KD, VD), lambda b: (b, 0, 0)),
        compiler_params=pltpu.CompilerParams(
            dimension_semantics=("parallel",),               # megacore sharding on v7x
            vmem_limit_bytes=vmem_limit),
    )(x_local, wv)


def _reference(x_local, x_global, wv, wk, wq, key_dim):
    # pure-JAX transcription of the PyTorch forward (for correctness check)
    B, L, C = x_local.shape
    G = x_global.shape[1]
    xl = x_local.astype(jnp.float32)
    xg = x_global.astype(jnp.float32)
    xg_rep = jnp.broadcast_to(xg[:, None, :], (B, key_dim, G))
    Q = jnp.tanh(jnp.einsum("bkg,gd->bkd", xg_rep, wq.astype(jnp.float32)))
    K = jnp.tanh(jnp.einsum("blc,cd->bld", xl, wk.astype(jnp.float32)))
    V = jax.nn.gelu(jnp.einsum("blc,cd->bld", xl, wv.astype(jnp.float32)),
                    approximate=False)
    scores = jnp.einsum("bkd,bld->bkl", Q, K) / jnp.sqrt(jnp.float32(key_dim))
    attn = jax.nn.softmax(scores, axis=1)
    return jnp.einsum("bkl,blv->bkv", attn, V)


if __name__ == "__main__":
    # small shapes consistent with the module
    B = 4
    seq_len = 16        # L
    local_dim = 8       # C
    global_dim = 16     # G
    key_dim = 8
    value_dim = 8

    key = jax.random.PRNGKey(0)
    k1, k2, k3, k4, k5 = jax.random.split(key, 5)
    x_local = jax.random.normal(k1, (B, seq_len, local_dim), jnp.float32)
    x_global = jax.random.normal(k2, (B, global_dim), jnp.float32)
    wv = jax.random.normal(k3, (local_dim, value_dim), jnp.float32)   # torch.randn init
    wk = jax.random.normal(k4, (local_dim, key_dim), jnp.float32)
    wq = jax.random.normal(k5, (global_dim, key_dim), jnp.float32)

    ref = _reference(x_local, x_global, wv, wk, wq, key_dim)

    # default (collapsed) kernel
    out = global_attention_head(x_local, x_global, wv, wk, wq, key_dim=key_dim)
    out = jax.block_until_ready(out)
    assert out.shape == (B, key_dim, value_dim)
    assert bool(jnp.all(jnp.isfinite(out)))
    assert bool(jnp.allclose(out, ref, atol=1e-4, rtol=1e-4))

    # literal path (flagged) cross-check
    out_lit = global_attention_head(x_local, x_global, wv, wk, wq,
                                    key_dim=key_dim, literal=True)
    out_lit = jax.block_until_ready(out_lit)
    assert bool(jnp.allclose(out_lit, ref, atol=1e-4, rtol=1e-4))

    print("KERNEL_OK")
</pallas_src>

<mosaic_0001>
module attributes {stable_mosaic.version = 11 : i64} {
  func.func @kernel(%arg0: i32, %arg1: memref<2x16x8xf32, #tpu.memory_space<vmem>>, %arg2: memref<8x8xf32, #tpu.memory_space<vmem>>, %arg3: memref<2x8x8xf32, #tpu.memory_space<vmem>>) attributes {dimension_semantics = [#tpu.dimension_semantics<parallel>], iteration_bounds = array<i64: 2>, scalar_prefetch = 0 : i64, scratch_operands = 0 : i64, tpu.core_type = #tpu.core_type<tc>, window_params = [{transform_indices = @transform_0, window_bounds = array<i64: 2, 16, 8>}, {pipeline_mode = #tpu.pipeline_mode<synchronous>, transform_indices = @transform_1, window_bounds = array<i64: 8, 8>}, {transform_indices = @transform_2, window_bounds = array<i64: 2, 8, 8>}]} {
    %c0 = arith.constant 0 : index
    %c0_0 = arith.constant 0 : index
    %c0_1 = arith.constant 0 : index
    %0 = vector.load %arg1[%c0, %c0_0, %c0_1] : memref<2x16x8xf32, #tpu.memory_space<vmem>>, vector<2x16x8xf32>
    %1 = vector.shape_cast %0 : vector<2x16x8xf32> to vector<32x8xf32>
    %c0_2 = arith.constant 0 : index
    %c0_3 = arith.constant 0 : index
    %2 = vector.load %arg2[%c0_2, %c0_3] : memref<8x8xf32, #tpu.memory_space<vmem>>, vector<8x8xf32>
    %cst = arith.constant dense<0.000000e+00> : vector<32x8xf32>
    %3 = tpu.matmul %1, %2, %cst {dimension_numbers = #tpu.dot_dimension_numbers<[1], [0], [0], [1], [0, 0, 1, 1], [], []>} : vector<32x8xf32>, vector<8x8xf32>, vector<32x8xf32> -> vector<32x8xf32>
    %cst_4 = arith.constant 5.000000e-01 : f32
    %4 = vector.broadcast %cst_4 : f32 to vector<32x8xf32>
    %5 = arith.mulf %4, %3 : vector<32x8xf32>
    %cst_5 = arith.constant 0.707106769 : f32
    %6 = vector.broadcast %cst_5 : f32 to vector<32x8xf32>
    %7 = arith.mulf %3, %6 : vector<32x8xf32>
    %cst_6 = arith.constant 0.000000e+00 : f32
    %8 = vector.broadcast %cst_6 : f32 to vector<32x8xf32>
    %9 = arith.cmpf oge, %7, %8 : vector<32x8xf32>
    %cst_7 = arith.constant 1.000000e+00 : f32
    %cst_8 = arith.constant -1.000000e+00 : f32
    %10 = vector.broadcast %cst_7 : f32 to vector<32x8xf32>
    %11 = vector.broadcast %cst_8 : f32 to vector<32x8xf32>
    %12 = arith.select %9, %10, %11 : vector<32x8xi1>, vector<32x8xf32>
    %13 = math.absf %7 : vector<32x8xf32>
    %cst_9 = arith.constant 0.327591091 : f32
    %14 = vector.broadcast %cst_9 : f32 to vector<32x8xf32>
    %15 = arith.mulf %14, %13 : vector<32x8xf32>
    %cst_10 = arith.constant 1.000000e+00 : f32
    %16 = vector.broadcast %cst_10 : f32 to vector<32x8xf32>
    %17 = arith.addf %16, %15 : vector<32x8xf32>
    %cst_11 = arith.constant 1.000000e+00 : f32
    %18 = vector.broadcast %cst_11 : f32 to vector<32x8xf32>
    %19 = arith.divf %18, %17 : vector<32x8xf32>
    %cst_12 = arith.constant 1.06140542 : f32
    %20 = vector.broadcast %cst_12 : f32 to vector<32x8xf32>
    %21 = arith.mulf %20, %19 : vector<32x8xf32>
    %cst_13 = arith.constant -1.45315206 : f32
    %22 = vector.broadcast %cst_13 : f32 to vector<32x8xf32>
    %23 = arith.addf %21, %22 : vector<32x8xf32>
    %24 = arith.mulf %23, %19 : vector<32x8xf32>
    %cst_14 = arith.constant 1.42141378 : f32
    %25 = vector.broadcast %cst_14 : f32 to vector<32x8xf32>
    %26 = arith.addf %24, %25 : vector<32x8xf32>
    %27 = arith.mulf %26, %19 : vector<32x8xf32>
    %cst_15 = arith.constant -0.284496725 : f32
    %28 = vector.broadcast %cst_15 : f32 to vector<32x8xf32>
    %29 = arith.addf %27, %28 : vector<32x8xf32>
    %30 = arith.mulf %29, %19 : vector<32x8xf32>
    %cst_16 = arith.constant 0.254829586 : f32
    %31 = vector.broadcast %cst_16 : f32 to vector<32x8xf32>
    %32 = arith.addf %30, %31 : vector<32x8xf32>
    %33 = arith.mulf %32, %19 : vector<32x8xf32>
    %cst_17 = arith.constant 0.000000e+00 : f32
    %34 = vector.broadcast %cst_17 : f32 to vector<32x8xf32>
    %35 = arith.subf %34, %13 : vector<32x8xf32>
    %36 = arith.mulf %35, %13 : vector<32x8xf32>
    %37 = math.exp %36 : vector<32x8xf32>
    %38 = arith.mulf %33, %37 : vector<32x8xf32>
    %cst_18 = arith.constant 1.000000e+00 : f32
    %39 = vector.broadcast %cst_18 : f32 to vector<32x8xf32>
    %40 = arith.subf %39, %38 : vector<32x8xf32>
    %41 = arith.mulf %12, %40 : vector<32x8xf32>
    %cst_19 = arith.constant 1.000000e+00 : f32
    %42 = vector.broadcast %cst_19 : f32 to vector<32x8xf32>
    %43 = arith.addf %42, %41 : vector<32x8xf32>
    %44 = arith.mulf %5, %43 : vector<32x8xf32>
    %45 = vector.shape_cast %44 : vector<32x8xf32> to vector<2x16x8xf32>
    %cst_20 = arith.constant dense<0.000000e+00> : vector<2x8xf32>
    %46 = vector.multi_reduction <add>, %45, %cst_20 [1] : vector<2x16x8xf32> to vector<2x8xf32>
    %cst_21 = arith.constant 1.250000e-01 : f32
    %47 = vector.broadcast %cst_21 : f32 to vector<2x8xf32>
    %48 = arith.mulf %46, %47 : vector<2x8xf32>
    %49 = vector.shape_cast %48 : vector<2x8xf32> to vector<2x1x8xf32>
    %50 = vector.shape_cast %49 : vector<2x1x8xf32> to vector<2x1x8xf32>
    %51 = vector.broadcast %50 : vector<2x1x8xf32> to vector<2x8x8xf32>
    %c0_22 = arith.constant 0 : index
    %c0_23 = arith.constant 0 : index
    %c0_24 = arith.constant 0 : index
    %52 = vector.load %arg3[%c0_22, %c0_23, %c0_24] : memref<2x8x8xf32, #tpu.memory_space<vmem>>, vector<2x8x8xf32>
    tpu.vector_store %arg3[%c0_22, %c0_23, %c0_24], %51 {strides = array<i32>} : memref<2x8x8xf32, #tpu.memory_space<vmem>>, vector<2x8x8xf32>,
    return
  }
  func.func @transform_0(%arg0: i32) -> (i32, i32, i32) {
    %c0_i32 = arith.constant 0 : i32
    %c0_i32_0 = arith.constant 0 : i32
    %c0_i32_1 = arith.constant 0 : i32
    return %arg0, %c0_i32, %c0_i32_0 : i32, i32, i32
  }
  func.func @transform_1(%arg0: i32) -> (i32, i32) {
    %c0_i32 = arith.constant 0 : i32
    %c0_i32_0 = arith.constant 0 : i32
    %c0_i32_1 = arith.constant 0 : i32
    return %c0_i32, %c0_i32_0 : i32, i32
  }
  func.func @transform_2(%arg0: i32) -> (i32, i32, i32) {
    %c0_i32 = arith.constant 0 : i32
    %c0_i32_0 = arith.constant 0 : i32
    %c0_i32_1 = arith.constant 0 : i32
    return %arg0, %c0_i32, %c0_i32_0 : i32, i32, i32
  }
}

</mosaic_0001>

<bundles_post_ra>
// kernel: tpu_custom_call.1
= control target key start
LH: loop header
LB: loop body
LE: loop exit
PB: predicated region body
PF: predicated region fallthrough
CT: control target
= control target key end

     0   :  { %7 = vsyncpa [#allocation3], 0  ;;  %s779_s0 = inlined_call_operand.vmem [shape: f32[4,16,8], index: 0, kind: input, shape index: {}]   ;;  %s780_s1 = inlined_call_operand.vmem [shape: f32[8,8], index: 1, kind: input, shape index: {}]   ;;  %s781_s2 = inlined_call_operand.hbm [shape: f32[4,8,8], index: 2, kind: output, shape index: {}]  }
   0x1   :  { %9 = vsyncpa [#allocation3 + $0x1], 0  ;;  %s632_s9 = smov 0   ;;  %s634_s10 = smov 0  }
   0x2   :  { %s636_s11 = smov 0   ;;  %s638_s12 = smov 0  }
   0x3 LB: > { %s653_s13 = sadd.s32 4294967295, %s611_s12   ;;  %s457_s14 = sadd.s32 4294967294, %s611_s12   ;;  %s611_s12 = sphi %s638_s12, %s787_s12   ;;  %s607_s11 = sphi %s636_s11, %s786_s11   ;;  %s603_s10 = sphi %s634_s10, %s785_s10   ;;  %s599_s9 = sphi %s632_s9, %s784_s9  }
   0x4   : > { %s657_s15 = sadd.s32 1, %s611_s12   ;;  %s69_s16 = sadd.s32 1, %s607_s11 }
   0x5   : > { %s66_s17 = ssub.s32 %s611_s12, %s657_s15  ;;  %p79_p0 = scmp.ne.s32.totalorder %s607_s11, %s603_s10 }
   0x6   : > { %p67_p1 = scmp.eq.s32.totalorder %s66_s17, 0  ;;  %p80_p2 = scmp.eq.s32.totalorder %s653_s13, 1 }
   0x7   : > { %p85_p3 = scmp.ne.s32.totalorder %s603_s10, %s599_s9  ;;  %p86_p4 = scmp.eq.s32.totalorder %s457_s14, 1 }
   0x8   : > { %s668_s18 = scalar_select %p67_p1, %s607_s11, %s69_s16  }
   0x9   : > { %p670_p5 = por %p80_p2, %p79_p0  ;;  %p674_p6 = por %p86_p4, %p85_p3 }
   0xa   : > { %p460_p7 = scmp.ge.s32.totalorder %s611_s12, 1  ;;  %p117_p8 = scmp.lt.s32.totalorder %s611_s12, 3 }
   0xc   : > { %p118_p9 = pnand %p460_p7, %p117_p8 }
   0xd   : > { %v152_v0 = vld [vmem:[%s780_s1] sm:$0xff] (!%p118_p9)  ;;  %s462_s23 = sshll.u32 (!%p118_p9), %s653_s13, 1  ;;  %vm153_vm0 = vcmask (!%p118_p9), 64512   ;;  %s137_s28 = sand.u32 (!%p118_p9), 1, %s603_s10  }
   0xe   : > { %121 = sbr.rel (%p118_p9) target bundleno = 320 (0x140), region = 28  ;;  %481 = vmatprep.subr.mxu0 (!%p118_p9), %v152_v0  ;;  %489 = vmatprep.subr.mxu1 (!%p118_p9), %v152_v0  ;;  %p141_p10 = scmp.lt.s32.totalorder (!%p118_p9), %s462_s23, 3 }
   0xf   : > { %482 = vmatpush3.msra.mxu0 (!%p118_p9), %v152_v0  ;;  %490 = vmatpush3.msra.mxu1 (!%p118_p9), %v152_v0  ;;  %s461_s29 = sshll.u32 (!%p118_p9), %s137_s28, 4  ;;  %s475_s30 = sshll.u32 (!%p118_p9), %s653_s13, 8 }
  0x10   : > { %s139_s3 = scalar_lea.vmem (!%p118_p9), [#allocation2], %s461_s29  ;;  %s733_s7 = scalar_lea.hbm (!%p118_p9), %s781_s2, %s475_s30 }
  0x11   : > { %s395_s4 = sshll.u32 (!%p118_p9), %s139_s3, 4  ;;  %s738_s8 = scalar_lea.sflag (!%p118_p9), [#allocation3], %s137_s28  ;;  %s735_s4 = int_to_ptr.vmem [resolvable:$true] %s395_s4 }
  0x12   : > { %s549_s13 = scalar_lea.vmem (!%p118_p9), %s735_s4, 256  ;;  %s614_s14 = smov (!%p118_p9), [#allocation2]  }
  0x13   : > { %p550_p11 = scmp.ne.s32.totalorder (!%p118_p9), %s735_s4, %s549_s13  ;;  %s553_s16 = sshll.u32 (!%p118_p9), %s614_s14, 4  ;;  %s554_s16 = int_to_ptr.vmem [resolvable:$false] %s553_s16 }
  0x14   : > { %s555_s17 = scalar_lea.vmem (!%p118_p9), %s554_s16, 512  ;;  %p556_p0 = scmp.lt.s32.totalorder (!%p118_p9), %s735_s4, %s554_s16 }
  0x15   : > { %s789_s23 = smov (!%p141_p10, %s462_s23), 3  ;;  %p551_p12 = pnand %p550_p11, %p670_p5 }
  0x16   : > { %s474_s24 = sshll.u32 %s789_s23, 4  ;;  %p557_p1 = scmp.lt.s32.totalorder %s555_s17, %s549_s13 }
  0x17   : > { %s145_s27 = scalar_lea.vmem %s779_s0, %s474_s24  ;;  %p552_p13 = pneg %p551_p12 }
  0x18   : > { %v148_v1 = vld [vmem:[%s145_s27] sm:$0xff]  ;;  %v150_v2 = vld [vmem:[%s145_s27 + $0x10] sm:$0xff]  ;;  %v149_v3 = vld [vmem:[%s145_s27 + $0x8] sm:$0xff]  ;;  %p558_p2 = por %p557_p1, %p556_p0 }
  0x19   : > { %483 = vmatprep.mubr.msk.f32.mxu0 %vm153_vm0, %v148_v1  ;;  %486 = vmatprep.mubr.msk.f32.mxu1 %vm153_vm0, %v150_v2  ;;  %v151_v4 = vld [vmem:[%s145_s27 + $0x18] sm:$0xff] }
  0x1a   : > { %484 = vmatmul.mubr.msk.f32.vlgmr.msra.gmra.mrb[0].mxu0 %vm153_vm0, %v149_v3  ;;  %487 = vmatmul.mubr.msk.f32.vlgmr.msra.gmra.mrb[0].mxu1 %vm153_vm0, %v151_v4  ;;  %p559_p3 = pnand %p558_p2, %p552_p13 }
  0xed   : > { %v691_v5 = vpop.f32.mrb[0].mxu0  ;;  %v693_v6 = vpop.f32.mrb[0].mxu1 }
  0xee   : > { %v696_v7 = vmul.f32 0.70710677, %v691_v5  ;;  %v699_v8 = vmul.f32 0.70710677, %v693_v6  ;;  %v701_v9 = vpop.f32.mrb[1].mxu0  ;;  %v703_v10 = vpop.f32.mrb[1].mxu1 }
  0xef   : > { %v708_v13 = vmul.f32 0.70710677, %v701_v9  ;;  %v712_v17 = vmul.f32 0.70710677, %v703_v10 }
  0xf0   : > { %v268_v11 = vand.u32 2147483647, %v696_v7  ;;  %v270_v12 = vand.u32 2147483647, %v699_v8  ;;  %vm260_vm1 = vcmp.ge.f32.partialorder %v696_v7, 0.0  ;;  %vm262_vm2 = vcmp.ge.f32.partialorder %v699_v8, 0.0 }
  0xf1   : > { %v267_v16 = vand.u32 2147483647, %v708_v13  ;;  %v269_v22 = vand.u32 2147483647, %v712_v17  ;;  %vm259_vm3 = vcmp.ge.f32.partialorder %v708_v13, 0.0  ;;  %vm261_vm4 = vcmp.ge.f32.partialorder %v712_v17, 0.0 }
  0xf2   : > { %v272_v14 = vmul.f32 0.3275911, %v268_v11  ;;  %v274_v15 = vmul.f32 0.3275911, %v270_v12  ;;  %v324_v25 = vsub.f32 0.0, %v268_v11  ;;  %v326_v26 = vsub.f32 0.0, %v270_v12 }
  0xf3   : > { %v271_v20 = vmul.f32 0.3275911, %v267_v16  ;;  %v273_v23 = vmul.f32 0.3275911, %v269_v22  ;;  %v323_v29 = vsub.f32 0.0, %v267_v16  ;;  %v325_v35 = vsub.f32 0.0, %v269_v22 }
  0xf4   : > { %v276_v18 = vadd.f32 1.0, %v272_v14  ;;  %v278_v19 = vadd.f32 1.0, %v274_v15  ;;  %v328_v28 = vmul.f32 %v324_v25, %v268_v11  ;;  %v330_v32 = vmul.f32 %v326_v26, %v270_v12 }
  0xf5   : > { %v275_v21 = vadd.f32 1.0, %v271_v20  ;;  %v277_v24 = vadd.f32 1.0, %v273_v23  ;;  %v327_v39 = vmul.f32 %v323_v29, %v267_v16  ;;  %v329_v47 = vmul.f32 %v325_v35, %v269_v22 }
  0xf6   : > { %533 = vrcp.f32 %v276_v18  ;;  %v333_v37 = vmul.f32 1.442695, %v328_v28  ;;  %v337_v41 = vmul.f32 1.442695, %v330_v32  ;;  %v613_v25 = vmov -1.0  }
  0xf7   : > { %535 = vrcp.f32 %v278_v19  ;;  %v331_v49 = vmul.f32 1.442695, %v327_v39  ;;  %v335_v57 = vmul.f32 1.442695, %v329_v47  ;;  %v264_v26 = vsel %vm260_vm1, 1.0, %v613_v25 }
  0xf8   : > { %537 = vrcp.f32 %v275_v21  ;;  %v251_v13 = vmul.f32 0.5, %v701_v9 }
  0xf9   : > { %539 = vrcp.f32 %v277_v24 }
  0xfa   : > { %541 = vpow2.f32 %v333_v37 }
  0xfb   : > { %543 = vpow2.f32 %v337_v41  ;;  %v254_v41 = vmul.f32 0.5, %v693_v6 }
  0xfc   : > { %545 = vpow2.f32 %v331_v49 }
  0xfd   : > { %547 = vpow2.f32 %v335_v57 }
 0x100   : > { %v534_v27 = vpop.eup %533 }
 0x101   : > { %v536_v30 = vpop.eup %535  ;;  %v288_v31 = vmul.f32 1.0614054, %v534_v27 }
 0x102   : > { %v290_v33 = vmul.f32 1.0614054, %v536_v30  ;;  %v538_v36 = vpop.eup %537 }
 0x103   : > { %v292_v34 = vadd.f32 -1.4531521, %v288_v31  ;;  %v287_v42 = vmul.f32 1.0614054, %v538_v36  ;;  %v540_v44 = vpop.eup %539  ;;  %v266_v31 = vsel %vm262_vm2, 1.0, %v613_v25 }
 0x104   : > { %v294_v38 = vadd.f32 -1.4531521, %v290_v33  ;;  %v289_v50 = vmul.f32 1.0614054, %v540_v44  ;;  %v542_v12 = vpop.eup %541 }
 0x105   : > { %v296_v40 = vmul.f32 %v534_v27, %v292_v34  ;;  %v291_v46 = vadd.f32 -1.4531521, %v287_v42  ;;  %v544_v16 = vpop.eup %543  ;;  %v252_v34 = vmul.f32 0.5, %v691_v5 }
 0x106   : > { %v298_v43 = vmul.f32 %v536_v30, %v294_v38  ;;  %v293_v54 = vadd.f32 -1.4531521, %v289_v50  ;;  %v546_v24 = vpop.eup %545  ;;  %v263_v38 = vsel %vm259_vm3, 1.0, %v613_v25 }
 0x107   : > { %v300_v45 = vadd.f32 1.4214138, %v296_v40  ;;  %v295_v52 = vmul.f32 %v538_v36, %v291_v46  ;;  %v548_v33 = vpop.eup %547 }
 0x108   : > { %v302_v48 = vadd.f32 1.4214138, %v298_v43  ;;  %v297_v59 = vmul.f32 %v540_v44, %v293_v54 }
 0x109   : > { %v304_v51 = vmul.f32 %v534_v27, %v300_v45  ;;  %v299_v56 = vadd.f32 1.4214138, %v295_v52 }
 0x10a   : > { %v306_v53 = vmul.f32 %v536_v30, %v302_v48  ;;  %v301_v63 = vadd.f32 1.4214138, %v297_v59  ;;  %v253_v48 = vmul.f32 0.5, %v703_v10 }
 0x10b   : > { %v308_v55 = vadd.f32 -0.28449672, %v304_v51  ;;  %v303_v61 = vmul.f32 %v538_v36, %v299_v56 }
 0x10c   : > { %v310_v58 = vadd.f32 -0.28449672, %v306_v53  ;;  %v305_v3 = vmul.f32 %v540_v44, %v301_v63 }
 0x10d   : > { %v312_v60 = vmul.f32 %v534_v27, %v308_v55  ;;  %v307_v1 = vadd.f32 -0.28449672, %v303_v61 }
 0x10e   : > { %v314_v62 = vmul.f32 %v536_v30, %v310_v58  ;;  %v309_v15 = vadd.f32 -0.28449672, %v305_v3 }
 0x10f   : > { %v316_v0 = vadd.f32 0.2548296, %v312_v60  ;;  %v311_v11 = vmul.f32 %v538_v36, %v307_v1 }
 0x110   : > { %v318_v2 = vadd.f32 0.2548296, %v314_v62  ;;  %v313_v21 = vmul.f32 %v540_v44, %v309_v15 }
 0x111   : > { %v320_v4 = vmul.f32 %v534_v27, %v316_v0  ;;  %v315_v19 = vadd.f32 0.2548296, %v311_v11 }
 0x112   : > { %v322_v14 = vmul.f32 %v536_v30, %v318_v2  ;;  %v317_v27 = vadd.f32 0.2548296, %v313_v21 }
 0x113   : > { %v340_v18 = vmul.f32 %v542_v12, %v320_v4  ;;  %v319_v23 = vmul.f32 %v538_v36, %v315_v19 }
 0x114   : > { %v342_v20 = vmul.f32 %v544_v16, %v322_v14  ;;  %v321_v7 = vmul.f32 %v540_v44, %v317_v27  ;;  %v265_v44 = vsel %vm261_vm4, 1.0, %v613_v25 }
 0x115   : > { %v344_v22 = vsub.f32 1.0, %v340_v18  ;;  %v339_v30 = vmul.f32 %v546_v24, %v319_v23 }
 0x116   : > { %v346_v28 = vsub.f32 1.0, %v342_v20  ;;  %v341_v36 = vmul.f32 %v548_v33, %v321_v7 }
 0x117   : > { %v348_v29 = vmul.f32 %v344_v22, %v264_v26  ;;  %v343_v35 = vsub.f32 1.0, %v339_v30 }
 0x118   : > { %v350_v32 = vmul.f32 %v346_v28, %v266_v31  ;;  %v345_v42 = vsub.f32 1.0, %v341_v36 }
 0x119   : > { %v352_v8 = vadd.f32 1.0, %v348_v29  ;;  %v347_v40 = vmul.f32 %v343_v35, %v263_v38 }
 0x11a   : > { %v354_v37 = vadd.f32 1.0, %v350_v32  ;;  %v349_v46 = vmul.f32 %v345_v42, %v265_v44 }
 0x11b   : > { %v356_v39 = vmul.f32 %v352_v8, %v252_v34  ;;  %v351_v43 = vadd.f32 1.0, %v347_v40 }
 0x11c   : > { %v358_v45 = vmul.f32 %v354_v37, %v254_v41  ;;  %v353_v49 = vadd.f32 1.0, %v349_v46 }
 0x11d   : > { %v360_v5 = vsel %vm153_vm0, %v356_v39, 0.0  ;;  %v355_v47 = vmul.f32 %v351_v43, %v251_v13 }
 0x11e   : > { %v369_v50 = vsel %vm153_vm0, %v358_v45, 0.0  ;;  %v357_v6 = vmul.f32 %v353_v49, %v253_v48 }
 0x11f   : > { %v359_v17 = vsel %vm153_vm0, %v355_v47, 0.0 }
 0x120   : > { %v361_v51 = vadd.f32 %v360_v5, %v359_v17  ;;  %v368_v9 = vsel %vm153_vm0, %v357_v6, 0.0 }
 0x121   : > { %v370_v53 = vadd.f32 %v369_v50, %v368_v9 }
 0x122   : > { %v362_v52 = vrot.slane %v361_v51, 4 }
 0x123   : > { %v371_v55 = vrot.slane %v370_v53, 4 }
 0x124   : > { %v363_v54 = vadd.f32 %v362_v52, %v361_v51 }
 0x125   : > { %v372_v57 = vadd.f32 %v371_v55, %v370_v53 }
 0x126   : > { %v364_v56 = vrot.slane %v363_v54, 2 }
 0x127   : > { %v373_v10 = vrot.slane %v372_v57, 2 }
 0x128   : > { %v365_v58 = vadd.f32 %v364_v56, %v363_v54 }
 0x129   : > { %v374_v60 = vadd.f32 %v373_v10, %v372_v57 }
 0x12a   : > { %v366_v59 = vrot.slane %v365_v58, 1 }
 0x12b   : > { %v375_v62 = vrot.slane %v374_v60, 1 }
 0x12c   : > { %v367_v61 = vadd.f32 %v366_v59, %v365_v58 }
 0x12d   : > { %v376_v0 = vadd.f32 %v375_v62, %v374_v60 }
 0x12e   : > { %v377_v63 = vmul.f32 0.125, %v367_v61 }
 0x12f   : > { %v378_v1 = vmul.f32 0.125, %v376_v0 }
 0x130   : > { %379 = vst.msk [vmem:[%s139_s3] sm:$0xff] %vm153_vm0, %v377_v63 }
 0x131   : > { %380 = vst.msk [vmem:[%s139_s3 + $0x8] sm:$0xff] %vm153_vm0, %v378_v1 }
 0x132   : > { %562 = shalt.err (!%p559_p3)
}
 0x133   : > { %s563_s21 = scalar_lea.hbm %s733_s7, 256  ;;  %s567_s24 = scalar_lea.hbm %s781_s2, 512 }
 0x134   : > { %p564_p4 = scmp.ne.s32.totalorder %s733_s7, %s563_s21  ;;  %p568_p9 = scmp.lt.u32.totalorder %s733_s7, %s781_s2 }
 0x135   : > { %p569_p10 = scmp.lt.u32.totalorder %s567_s24, %s563_s21  ;;  %p571_p12 = scmp.lt.u32.totalorder %s563_s21, %s733_s7 }
 0x136   : > { %p565_p7 = pnand %p564_p4, %p670_p5 }
 0x137   : > { %p570_p11 = por %p569_p10, %p568_p9 }
 0x138   : > { %p566_p8 = pneg %p565_p7 }
 0x139   : > { %p572_p13 = por %p571_p12, %p570_p11 }
 0x13b   : > { %p573_p0 = pnand %p572_p13, %p566_p8 }
 0x13d   : > { %576 = shalt.err (!%p573_p0)
}
 0x13e   : > { %s615_s27 = smov 128   ;;  %s616_s28 = smov 8  }
 0x13f   : > { %491 = dma.vmem_to_hbm [thread:$0]  (%p670_p5), %s735_s4, 256, %s733_s7, %s738_s8, %s615_s27, %s615_s27, %s616_s28  }
 0x140 PF: > { %p497_p1 = scmp.ge.s32.totalorder %s611_s12, 2  ;;  %s410_s29 = sand.u32 1, %s599_s9  }
 0x141   : > { %s411_s30 = scalar_lea.sflag [#allocation3], %s410_s29 }
 0x142   : > { %p494_p2 = pnand %p497_p1, %p674_p6 }
 0x144   : > { %594 = dma.done.wait (!%p494_p2), %s411_s30, 256  }
 0x145   : > { %596 = vsyncadd (!%p494_p2), %s411_s30, 4294967040  ;;  %p12_p3 = scmp.ge.s32.totalorder %s657_s15, 4   ;;  %s784_s9 = smov %s603_s10 }
 0x146   : > { %s785_s10 = smov %s607_s11  ;;  %s786_s11 = smov %s668_s18 }
 0x147   : > { %s787_s12 = smov %s657_s15  ;;  %14 = sbr.rel (!%p12_p3) target bundleno = 3 (0x3), region = 63 }
 0x14e   :  { %416 = vsyncpa [#allocation3], 1 }
 0x14f   :  { %418 = vsyncpa [#allocation3 + $0x1], 1 }

</bundles_post_ra>
